<compile_context>
chip_gen: v7x
topology: tpu7x:2x2x1
jax: 0.10.0
libtpu: 0.0.40
codegen_flags: <defaults>
</compile_context>

<pallas_src>
import jax
import jax.numpy as jnp
from jax.experimental import pallas as pl
from jax.experimental.pallas import tpu as pltpu

EPS = 1e-5


# ----------------------------------------------------------------------------
# Shared in-kernel conv: 2x nearest upsample + pad(1) + 3x3 conv (bias folded
# out, see wrapper) for one (batch, row-strip) block, as lane-dense matmuls.
# ----------------------------------------------------------------------------
def _conv_rows(x_ref, rsel_ref, cmat_ref):
    # x_ref   : (1, H, W*Cin)        original-resolution input rows (f32)
    # rsel_ref: (1, TH+2, H)         0/1 row selection (H-upsample + H-pad), bf16
    # cmat_ref: (3, W*Cin, W2*Cout)  banded weights (W-upsample + W-pad + kw), bf16
    th = rsel_ref.shape[1] - 2                     # output rows in this strip

    x = x_ref[0].astype(jnp.bfloat16)              # (H, W*Cin)   bf16 MXU operand
    rsel = rsel_ref[0]                             # (TH+2, H)

    # Rows of the zero-padded 2x-upsampled image needed by this strip.
    # 0/1 selection -> exact pick of bf16 values; accumulate in f32.
    xh = jnp.dot(rsel, x, preferred_element_type=jnp.float32)
    xh = xh.astype(jnp.bfloat16)                   # (TH+2, W*Cin)

    # One matmul per kh tap-row: K = W*Cin, N = W2*Cout (lane dense), f32 acc.
    acc = jnp.dot(xh[0:th], cmat_ref[0], preferred_element_type=jnp.float32)
    for kh in range(1, cmat_ref.shape[0]):
        acc = acc + jnp.dot(xh[kh:kh + th], cmat_ref[kh],
                            preferred_element_type=jnp.float32)
    return acc                                     # (TH, W2*Cout) f32


# ----------------------------------------------------------------------------
# Pass 1: per-(batch, strip) partial sums for the BatchNorm batch statistics.
# The conv activation is never written to HBM.
# ----------------------------------------------------------------------------
def _conv_stats_kernel(x_ref, rsel_ref, cmat_ref, sum_ref, ssq_ref):
    acc = _conv_rows(x_ref, rsel_ref, cmat_ref)                     # (TH, W2*Cout)
    sum_ref[...] = jnp.sum(acc, axis=0, keepdims=True)[None, None]
    ssq_ref[...] = jnp.sum(acc * acc, axis=0, keepdims=True)[None, None]


# ----------------------------------------------------------------------------
# Pass 2: recompute the (cheap) conv and apply the fused BN affine + ReLU,
# writing the lane-dense (1, TH, W2*Cout) output block exactly once.
# ----------------------------------------------------------------------------
def _conv_bn_relu_kernel(x_ref, rsel_ref, cmat_ref, scale_ref, shift_ref, o_ref):
    acc = _conv_rows(x_ref, rsel_ref, cmat_ref)                     # (TH, W2*Cout)
    o_ref[0] = jnp.maximum(acc * scale_ref[...] + shift_ref[...], 0.0)


def _pick_strip_rows(h2, wcout, vmem_budget_bytes=4 << 20):
    """Row-strip height: the largest multiple-of-8 divisor of H2 whose
    double-buffered f32 strip stays within the VMEM budget.  Biggest tile that
    fits wins (per-grid-step overhead ~0.35us dominates at small sizes); the
    batch grid axis still provides megacore parallelism.  Falls back to the
    full height when H2 has no multiple-of-8 divisor."""
    divisors = [th for th in range(8, h2 + 1, 8) if h2 % th == 0]
    fitting = [th for th in divisors
               if 2 * (th + 2) * wcout * 4 <= vmem_budget_bytes]
    if fitting:
        return max(fitting)
    return min(divisors) if divisors else h2


# ----------------------------------------------------------------------------
# Wrapper: layout plumbing + weight preprocessing + the two pallas_calls.
# ----------------------------------------------------------------------------
@jax.jit
def upconv_forward(x_nchw, w, b, gamma, beta, eps=EPS):
    # x_nchw: (N, Cin, H, W) f32 ; w: (3, 3, Cin, Cout) ; b/gamma/beta: (Cout,)
    N, Cin, H, W = x_nchw.shape
    Cout = w.shape[-1]
    H2, W2 = 2 * H, 2 * W
    WCIN, WCOUT = W * Cin, W2 * Cout

    th = _pick_strip_rows(H2, WCOUT)
    n_strips = H2 // th

    # NOTE: the Conv2d bias `b` is folded out.  It is a per-channel constant,
    # and training-mode BatchNorm subtracts the batch mean, which removes that
    # constant exactly: shift = beta - mean_conv*scale with or without it.
    # (It would only matter for running_mean, which is not materialized.)
    del b

    # Layout plumbing: NCHW -> lane-dense (N, H, W*Cin) rows.  Only the small
    # original-resolution input is ever materialized; the 4x upsampled/padded
    # image exists only inside VMEM (as matmul results).
    x_rows = jnp.transpose(x_nchw, (0, 2, 3, 1)).reshape(N, H, WCIN)
    x_rows = x_rows.astype(jnp.float32)

    # --- weight preprocessing (tiny, pure JAX, traced once) -------------------
    # rsel[a, i] = 1 iff padded upsampled row a comes from input row i.
    a = jnp.arange(H2 + 2)
    src_row = (a - 1) // 2
    row_ok = (a >= 1) & (a <= H2)
    rsel_full = ((src_row[:, None] == jnp.arange(H)[None, :]) &
                 row_ok[:, None]).astype(jnp.bfloat16)               # (H2+2, H)
    # Overlapping (TH+2)-row slices, one per spatial grid step (halo included).
    rsel_strips = jnp.stack(
        [rsel_full[t * th:t * th + th + 2] for t in range(n_strips)], axis=0)

    # cmat[kh, j*Cin+c, s*Cout+o] = sum_kw w[kh,kw,c,o] *
    #   [output col s reads upsampled col s-1+kw, which comes from input col j]
    s = jnp.arange(W2)
    kw = jnp.arange(3)
    q = s[None, :] - 1 + kw[:, None]                                 # (3, W2)
    src_col = jnp.where((q >= 0) & (q < W2), q // 2, -1)
    wsel = (src_col[:, None, :] ==
            jnp.arange(W)[None, :, None]).astype(jnp.float32)        # (3, W, W2)
    cmat = jnp.einsum("kjs,hkco->hjcso", wsel, w.astype(jnp.float32))
    cmat = cmat.reshape(3, WCIN, WCOUT).astype(jnp.bfloat16)

    cparams = pltpu.CompilerParams(
        dimension_semantics=("parallel", "parallel"),
        vmem_limit_bytes=32 * 1024 * 1024,   # explicit; safe on v5e/v6e/v7x
    )

    # --- pass 1: partial per-(batch, strip) sum / sum-of-squares --------------
    sum_p, ssq_p = pl.pallas_call(
        _conv_stats_kernel,
        out_shape=(
            jax.ShapeDtypeStruct((N, n_strips, 1, WCOUT), jnp.float32),
            jax.ShapeDtypeStruct((N, n_strips, 1, WCOUT), jnp.float32),
        ),
        grid_spec=pltpu.PrefetchScalarGridSpec(
            num_scalar_prefetch=0,
            grid=(N, n_strips),
            in_specs=[
                pl.BlockSpec((1, H, WCIN), lambda n, t: (n, 0, 0)),
                pl.BlockSpec((1, th + 2, H), lambda n, t: (t, 0, 0)),
                pl.BlockSpec((3, WCIN, WCOUT), lambda n, t: (0, 0, 0)),
            ],
            out_specs=[
                pl.BlockSpec((1, 1, 1, WCOUT), lambda n, t: (n, t, 0, 0)),
                pl.BlockSpec((1, 1, 1, WCOUT), lambda n, t: (n, t, 0, 0)),
            ],
        ),
        compiler_params=cparams,
    )(x_rows, rsel_strips, cmat)

    # --- finalize training-mode BatchNorm batch statistics (tiny, plain JAX) --
    cnt = jnp.float32(N * H2 * W2)
    sum_c = jnp.sum(sum_p.reshape(-1, W2, Cout), axis=(0, 1))
    ssq_c = jnp.sum(ssq_p.reshape(-1, W2, Cout), axis=(0, 1))
    mean = sum_c / cnt
    var = jnp.maximum(ssq_c / cnt - mean * mean, 0.0)   # biased variance
    scale = gamma.astype(jnp.float32) / jnp.sqrt(var + eps)
    shift = beta.astype(jnp.float32) - mean * scale
    scale_row = jnp.tile(scale, W2)[None, :]             # (1, W2*Cout)
    shift_row = jnp.tile(shift, W2)[None, :]
    # TODO(synk): nn.BatchNorm2d's running_mean/running_var buffer update
    # (momentum) is not materialized; only the forward output is produced.

    # --- pass 2: conv (recomputed, cheap) + BN affine + ReLU -> output --------
    out_rows = pl.pallas_call(
        _conv_bn_relu_kernel,
        out_shape=jax.ShapeDtypeStruct((N, H2, WCOUT), jnp.float32),
        grid_spec=pltpu.PrefetchScalarGridSpec(
            num_scalar_prefetch=0,
            grid=(N, n_strips),
            in_specs=[
                pl.BlockSpec((1, H, WCIN), lambda n, t: (n, 0, 0)),
                pl.BlockSpec((1, th + 2, H), lambda n, t: (t, 0, 0)),
                pl.BlockSpec((3, WCIN, WCOUT), lambda n, t: (0, 0, 0)),
                pl.BlockSpec((1, WCOUT), lambda n, t: (0, 0)),
                pl.BlockSpec((1, WCOUT), lambda n, t: (0, 0)),
            ],
            out_specs=pl.BlockSpec((1, th, WCOUT), lambda n, t: (n, t, 0)),
        ),
        compiler_params=cparams,
    )(x_rows, rsel_strips, cmat, scale_row, shift_row)

    # Layout plumbing back to the module's NCHW output.
    out = out_rows.reshape(N, H2, W2, Cout)
    return jnp.transpose(out, (0, 3, 1, 2))


# ----------------------------------------------------------------------------
# Pure-JAX reference (f32, HIGHEST precision) for the correctness check.
# ----------------------------------------------------------------------------
def upconv_reference(x_nchw, w, b, gamma, beta, eps=EPS):
    x = jnp.repeat(jnp.repeat(x_nchw, 2, axis=2), 2, axis=3)
    w_oihw = jnp.transpose(w, (3, 2, 0, 1))              # (Cout, Cin, 3, 3)
    y = jax.lax.conv_general_dilated(
        x, w_oihw, window_strides=(1, 1), padding=((1, 1), (1, 1)),
        dimension_numbers=("NCHW", "OIHW", "NCHW"),
        precision=jax.lax.Precision.HIGHEST)
    y = y + b[None, :, None, None]
    mean = jnp.mean(y, axis=(0, 2, 3), keepdims=True)
    var = jnp.mean((y - mean) ** 2, axis=(0, 2, 3), keepdims=True)
    yn = (y - mean) / jnp.sqrt(var + eps)
    yn = yn * gamma[None, :, None, None] + beta[None, :, None, None]
    return jnp.maximum(yn, 0.0)


if __name__ == "__main__":
    N, C_IN, C_OUT, H, W = 2, 4, 8, 16, 16

    key = jax.random.PRNGKey(0)
    kx, kw_key, kb_key = jax.random.split(key, 3)

    x = jax.random.normal(kx, (N, C_IN, H, W), dtype=jnp.float32)
    # deterministic synthetic parameters (fresh module, not a checkpoint load)
    w = jax.random.normal(kw_key, (3, 3, C_IN, C_OUT), dtype=jnp.float32) * 0.1
    b = jax.random.normal(kb_key, (C_OUT,), dtype=jnp.float32) * 0.1
    gamma = jnp.ones((C_OUT,), dtype=jnp.float32)   # fresh nn.BatchNorm2d weight
    beta = jnp.zeros((C_OUT,), dtype=jnp.float32)   # fresh nn.BatchNorm2d bias

    out = jax.block_until_ready(upconv_forward(x, w, b, gamma, beta))

    ref = upconv_reference(x, w, b, gamma, beta)
    max_err = float(jnp.max(jnp.abs(out - ref)))
    # bf16 MXU operands (f32 accumulation) vs an all-f32 HIGHEST reference;
    # BN's 1/std rescaling amplifies the bf16 quantization, hence the 3e-2
    # budget (observed error is typically ~1e-2 or below at these magnitudes).
    ok = (out.shape == (N, C_OUT, 2 * H, 2 * W)) and (max_err < 3e-2)
    if not ok:
        raise AssertionError(f"mismatch: shape={out.shape}, max_err={max_err}")
    print("KERNEL_OK")
</pallas_src>

<mosaic_0001>
module attributes {stable_mosaic.version = 11 : i64} {
  func.func @_conv_stats_kernel(%arg0: i32, %arg1: i32, %arg2: memref<1x16x64xf32, #tpu.memory_space<vmem>>, %arg3: memref<1x34x16xbf16, #tpu.memory_space<vmem>>, %arg4: memref<3x64x256xbf16, #tpu.memory_space<vmem>>, %arg5: memref<1x1x1x256xf32, #tpu.memory_space<vmem>>, %arg6: memref<1x1x1x256xf32, #tpu.memory_space<vmem>>) attributes {dimension_semantics = [#tpu.dimension_semantics<parallel>, #tpu.dimension_semantics<parallel>], iteration_bounds = array<i64: 2, 1>, scalar_prefetch = 0 : i64, scratch_operands = 0 : i64, tpu.core_type = #tpu.core_type<tc>, window_params = [{transform_indices = @transform_0, window_bounds = array<i64: 1, 16, 64>}, {transform_indices = @transform_1, window_bounds = array<i64: 1, 34, 16>}, {pipeline_mode = #tpu.pipeline_mode<synchronous>, transform_indices = @transform_2, window_bounds = array<i64: 3, 64, 256>}, {transform_indices = @transform_3, window_bounds = array<i64: 1, 1, 1, 256>}, {transform_indices = @transform_4, window_bounds = array<i64: 1, 1, 1, 256>}]} {
    %c0 = arith.constant 0 : index
    %c0_0 = arith.constant 0 : index
    %c0_1 = arith.constant 0 : index
    %0 = vector.load %arg2[%c0, %c0_0, %c0_1] : memref<1x16x64xf32, #tpu.memory_space<vmem>>, vector<1x16x64xf32>
    %1 = vector.shape_cast %0 : vector<1x16x64xf32> to vector<16x64xf32>
    %2 = arith.truncf %1 : vector<16x64xf32> to vector<16x64xbf16>
    %c0_2 = arith.constant 0 : index
    %c0_3 = arith.constant 0 : index
    %c0_4 = arith.constant 0 : index
    %3 = vector.load %arg3[%c0_2, %c0_3, %c0_4] : memref<1x34x16xbf16, #tpu.memory_space<vmem>>, vector<1x34x16xbf16>
    %4 = vector.shape_cast %3 : vector<1x34x16xbf16> to vector<34x16xbf16>
    %cst = arith.constant dense<0.000000e+00> : vector<34x64xf32>
    %5 = tpu.matmul %4, %2, %cst {dimension_numbers = #tpu.dot_dimension_numbers<[1], [0], [0], [1], [0, 0, 1, 1], [], []>} : vector<34x16xbf16>, vector<16x64xbf16>, vector<34x64xf32> -> vector<34x64xf32>
    %6 = arith.truncf %5 : vector<34x64xf32> to vector<34x64xbf16>
    %7 = vector.extract_strided_slice %6 {offsets = [0, 0], sizes = [32, 64], strides = [1, 1]} : vector<34x64xbf16> to vector<32x64xbf16>
    %c0_5 = arith.constant 0 : index
    %c0_6 = arith.constant 0 : index
    %c0_7 = arith.constant 0 : index
    %8 = vector.load %arg4[%c0_5, %c0_6, %c0_7] : memref<3x64x256xbf16, #tpu.memory_space<vmem>>, vector<1x64x256xbf16>
    %9 = vector.shape_cast %8 : vector<1x64x256xbf16> to vector<64x256xbf16>
    %cst_8 = arith.constant dense<0.000000e+00> : vector<32x256xf32>
    %10 = tpu.matmul %7, %9, %cst_8 {dimension_numbers = #tpu.dot_dimension_numbers<[1], [0], [0], [1], [0, 0, 1, 1], [], []>} : vector<32x64xbf16>, vector<64x256xbf16>, vector<32x256xf32> -> vector<32x256xf32>
    %11 = vector.extract_strided_slice %6 {offsets = [1, 0], sizes = [32, 64], strides = [1, 1]} : vector<34x64xbf16> to vector<32x64xbf16>
    %c1 = arith.constant 1 : index
    %c0_9 = arith.constant 0 : index
    %c0_10 = arith.constant 0 : index
    %12 = vector.load %arg4[%c1, %c0_9, %c0_10] : memref<3x64x256xbf16, #tpu.memory_space<vmem>>, vector<1x64x256xbf16>
    %13 = vector.shape_cast %12 : vector<1x64x256xbf16> to vector<64x256xbf16>
    %cst_11 = arith.constant dense<0.000000e+00> : vector<32x256xf32>
    %14 = tpu.matmul %11, %13, %cst_11 {dimension_numbers = #tpu.dot_dimension_numbers<[1], [0], [0], [1], [0, 0, 1, 1], [], []>} : vector<32x64xbf16>, vector<64x256xbf16>, vector<32x256xf32> -> vector<32x256xf32>
    %15 = arith.addf %10, %14 : vector<32x256xf32>
    %16 = vector.extract_strided_slice %6 {offsets = [2, 0], sizes = [32, 64], strides = [1, 1]} : vector<34x64xbf16> to vector<32x64xbf16>
    %c2 = arith.constant 2 : index
    %c0_12 = arith.constant 0 : index
    %c0_13 = arith.constant 0 : index
    %17 = vector.load %arg4[%c2, %c0_12, %c0_13] : memref<3x64x256xbf16, #tpu.memory_space<vmem>>, vector<1x64x256xbf16>
    %18 = vector.shape_cast %17 : vector<1x64x256xbf16> to vector<64x256xbf16>
    %cst_14 = arith.constant dense<0.000000e+00> : vector<32x256xf32>
    %19 = tpu.matmul %16, %18, %cst_14 {dimension_numbers = #tpu.dot_dimension_numbers<[1], [0], [0], [1], [0, 0, 1, 1], [], []>} : vector<32x64xbf16>, vector<64x256xbf16>, vector<32x256xf32> -> vector<32x256xf32>
    %20 = arith.addf %15, %19 : vector<32x256xf32>
    %cst_15 = arith.constant dense<0.000000e+00> : vector<256xf32>
    %21 = vector.multi_reduction <add>, %20, %cst_15 [0] : vector<32x256xf32> to vector<256xf32>
    %22 = vector.shape_cast %21 : vector<256xf32> to vector<1x256xf32>
    %23 = vector.shape_cast %22 : vector<1x256xf32> to vector<1x1x1x256xf32>
    %c0_16 = arith.constant 0 : index
    %c0_17 = arith.constant 0 : index
    %c0_18 = arith.constant 0 : index
    %c0_19 = arith.constant 0 : index
    %24 = vector.load %arg5[%c0_16, %c0_17, %c0_18, %c0_19] : memref<1x1x1x256xf32, #tpu.memory_space<vmem>>, vector<1x1x1x256xf32>
    tpu.vector_store %arg5[%c0_16, %c0_17, %c0_18, %c0_19], %23 {strides = array<i32>} : memref<1x1x1x256xf32, #tpu.memory_space<vmem>>, vector<1x1x1x256xf32>,
    %25 = arith.mulf %20, %20 : vector<32x256xf32>
    %cst_20 = arith.constant dense<0.000000e+00> : vector<256xf32>
    %26 = vector.multi_reduction <add>, %25, %cst_20 [0] : vector<32x256xf32> to vector<256xf32>
    %27 = vector.shape_cast %26 : vector<256xf32> to vector<1x256xf32>
    %28 = vector.shape_cast %27 : vector<1x256xf32> to vector<1x1x1x256xf32>
    %c0_21 = arith.constant 0 : index
    %c0_22 = arith.constant 0 : index
    %c0_23 = arith.constant 0 : index
    %c0_24 = arith.constant 0 : index
    %29 = vector.load %arg6[%c0_21, %c0_22, %c0_23, %c0_24] : memref<1x1x1x256xf32, #tpu.memory_space<vmem>>, vector<1x1x1x256xf32>
    tpu.vector_store %arg6[%c0_21, %c0_22, %c0_23, %c0_24], %28 {strides = array<i32>} : memref<1x1x1x256xf32, #tpu.memory_space<vmem>>, vector<1x1x1x256xf32>,
    return
  }
  func.func @transform_0(%arg0: i32, %arg1: i32) -> (i32, i32, i32) {
    %c0_i32 = arith.constant 0 : i32
    %c0_i32_0 = arith.constant 0 : i32
    %c0_i32_1 = arith.constant 0 : i32
    return %arg0, %c0_i32, %c0_i32_0 : i32, i32, i32
  }
  func.func @transform_1(%arg0: i32, %arg1: i32) -> (i32, i32, i32) {
    %c0_i32 = arith.constant 0 : i32
    %c0_i32_0 = arith.constant 0 : i32
    %c0_i32_1 = arith.constant 0 : i32
    return %arg1, %c0_i32, %c0_i32_0 : i32, i32, i32
  }
  func.func @transform_2(%arg0: i32, %arg1: i32) -> (i32, i32, i32) {
    %c0_i32 = arith.constant 0 : i32
    %c0_i32_0 = arith.constant 0 : i32
    %c0_i32_1 = arith.constant 0 : i32
    %c0_i32_2 = arith.constant 0 : i32
    return %c0_i32, %c0_i32_0, %c0_i32_1 : i32, i32, i32
  }
  func.func @transform_3(%arg0: i32, %arg1: i32) -> (i32, i32, i32, i32) {
    %c0_i32 = arith.constant 0 : i32
    %c0_i32_0 = arith.constant 0 : i32
    %c0_i32_1 = arith.constant 0 : i32
    return %arg0, %arg1, %c0_i32, %c0_i32_0 : i32, i32, i32, i32
  }
  func.func @transform_4(%arg0: i32, %arg1: i32) -> (i32, i32, i32, i32) {
    %c0_i32 = arith.constant 0 : i32
    %c0_i32_0 = arith.constant 0 : i32
    %c0_i32_1 = arith.constant 0 : i32
    return %arg0, %arg1, %c0_i32, %c0_i32_0 : i32, i32, i32, i32
  }
}

module attributes {stable_mosaic.version = 11 : i64} {
  func.func @_conv_bn_relu_kernel(%arg0: i32, %arg1: i32, %arg2: memref<1x16x64xf32, #tpu.memory_space<vmem>>, %arg3: memref<1x34x16xbf16, #tpu.memory_space<vmem>>, %arg4: memref<3x64x256xbf16, #tpu.memory_space<vmem>>, %arg5: memref<1x256xf32, #tpu.memory_space<vmem>>, %arg6: memref<1x256xf32, #tpu.memory_space<vmem>>, %arg7: memref<1x32x256xf32, #tpu.memory_space<vmem>>) attributes {dimension_semantics = [#tpu.dimension_semantics<parallel>, #tpu.dimension_semantics<parallel>], iteration_bounds = array<i64: 2, 1>, scalar_prefetch = 0 : i64, scratch_operands = 0 : i64, tpu.core_type = #tpu.core_type<tc>, window_params = [{transform_indices = @transform_0, window_bounds = array<i64: 1, 16, 64>}, {transform_indices = @transform_1, window_bounds = array<i64: 1, 34, 16>}, {pipeline_mode = #tpu.pipeline_mode<synchronous>, transform_indices = @transform_2, window_bounds = array<i64: 3, 64, 256>}, {pipeline_mode = #tpu.pipeline_mode<synchronous>, transform_indices = @transform_3, window_bounds = array<i64: 1, 256>}, {pipeline_mode = #tpu.pipeline_mode<synchronous>, transform_indices = @transform_4, window_bounds = array<i64: 1, 256>}, {transform_indices = @transform_5, window_bounds = array<i64: 1, 32, 256>}]} {
    %c0 = arith.constant 0 : index
    %c0_0 = arith.constant 0 : index
    %c0_1 = arith.constant 0 : index
    %0 = vector.load %arg2[%c0, %c0_0, %c0_1] : memref<1x16x64xf32, #tpu.memory_space<vmem>>, vector<1x16x64xf32>
    %1 = vector.shape_cast %0 : vector<1x16x64xf32> to vector<16x64xf32>
    %2 = arith.truncf %1 : vector<16x64xf32> to vector<16x64xbf16>
    %c0_2 = arith.constant 0 : index
    %c0_3 = arith.constant 0 : index
    %c0_4 = arith.constant 0 : index
    %3 = vector.load %arg3[%c0_2, %c0_3, %c0_4] : memref<1x34x16xbf16, #tpu.memory_space<vmem>>, vector<1x34x16xbf16>
    %4 = vector.shape_cast %3 : vector<1x34x16xbf16> to vector<34x16xbf16>
    %cst = arith.constant dense<0.000000e+00> : vector<34x64xf32>
    %5 = tpu.matmul %4, %2, %cst {dimension_numbers = #tpu.dot_dimension_numbers<[1], [0], [0], [1], [0, 0, 1, 1], [], []>} : vector<34x16xbf16>, vector<16x64xbf16>, vector<34x64xf32> -> vector<34x64xf32>
    %6 = arith.truncf %5 : vector<34x64xf32> to vector<34x64xbf16>
    %7 = vector.extract_strided_slice %6 {offsets = [0, 0], sizes = [32, 64], strides = [1, 1]} : vector<34x64xbf16> to vector<32x64xbf16>
    %c0_5 = arith.constant 0 : index
    %c0_6 = arith.constant 0 : index
    %c0_7 = arith.constant 0 : index
    %8 = vector.load %arg4[%c0_5, %c0_6, %c0_7] : memref<3x64x256xbf16, #tpu.memory_space<vmem>>, vector<1x64x256xbf16>
    %9 = vector.shape_cast %8 : vector<1x64x256xbf16> to vector<64x256xbf16>
    %cst_8 = arith.constant dense<0.000000e+00> : vector<32x256xf32>
    %10 = tpu.matmul %7, %9, %cst_8 {dimension_numbers = #tpu.dot_dimension_numbers<[1], [0], [0], [1], [0, 0, 1, 1], [], []>} : vector<32x64xbf16>, vector<64x256xbf16>, vector<32x256xf32> -> vector<32x256xf32>
    %11 = vector.extract_strided_slice %6 {offsets = [1, 0], sizes = [32, 64], strides = [1, 1]} : vector<34x64xbf16> to vector<32x64xbf16>
    %c1 = arith.constant 1 : index
    %c0_9 = arith.constant 0 : index
    %c0_10 = arith.constant 0 : index
    %12 = vector.load %arg4[%c1, %c0_9, %c0_10] : memref<3x64x256xbf16, #tpu.memory_space<vmem>>, vector<1x64x256xbf16>
    %13 = vector.shape_cast %12 : vector<1x64x256xbf16> to vector<64x256xbf16>
    %cst_11 = arith.constant dense<0.000000e+00> : vector<32x256xf32>
    %14 = tpu.matmul %11, %13, %cst_11 {dimension_numbers = #tpu.dot_dimension_numbers<[1], [0], [0], [1], [0, 0, 1, 1], [], []>} : vector<32x64xbf16>, vector<64x256xbf16>, vector<32x256xf32> -> vector<32x256xf32>
    %15 = arith.addf %10, %14 : vector<32x256xf32>
    %16 = vector.extract_strided_slice %6 {offsets = [2, 0], sizes = [32, 64], strides = [1, 1]} : vector<34x64xbf16> to vector<32x64xbf16>
    %c2 = arith.constant 2 : index
    %c0_12 = arith.constant 0 : index
    %c0_13 = arith.constant 0 : index
    %17 = vector.load %arg4[%c2, %c0_12, %c0_13] : memref<3x64x256xbf16, #tpu.memory_space<vmem>>, vector<1x64x256xbf16>
    %18 = vector.shape_cast %17 : vector<1x64x256xbf16> to vector<64x256xbf16>
    %cst_14 = arith.constant dense<0.000000e+00> : vector<32x256xf32>
    %19 = tpu.matmul %16, %18, %cst_14 {dimension_numbers = #tpu.dot_dimension_numbers<[1], [0], [0], [1], [0, 0, 1, 1], [], []>} : vector<32x64xbf16>, vector<64x256xbf16>, vector<32x256xf32> -> vector<32x256xf32>
    %20 = arith.addf %15, %19 : vector<32x256xf32>
    %c0_15 = arith.constant 0 : index
    %c0_16 = arith.constant 0 : index
    %21 = vector.load %arg5[%c0_15, %c0_16] : memref<1x256xf32, #tpu.memory_space<vmem>>, vector<1x256xf32>
    %22 = vector.broadcast %21 : vector<1x256xf32> to vector<32x256xf32>
    %23 = arith.mulf %20, %22 : vector<32x256xf32>
    %c0_17 = arith.constant 0 : index
    %c0_18 = arith.constant 0 : index
    %24 = vector.load %arg6[%c0_17, %c0_18] : memref<1x256xf32, #tpu.memory_space<vmem>>, vector<1x256xf32>
    %25 = vector.broadcast %24 : vector<1x256xf32> to vector<32x256xf32>
    %26 = arith.addf %23, %25 : vector<32x256xf32>
    %cst_19 = arith.constant 0.000000e+00 : f32
    %27 = vector.broadcast %cst_19 : f32 to vector<32x256xf32>
    %28 = arith.maximumf %26, %27 : vector<32x256xf32>
    %c0_20 = arith.constant 0 : index
    %c0_21 = arith.constant 0 : index
    %c0_22 = arith.constant 0 : index
    %29 = vector.load %arg7[%c0_20, %c0_21, %c0_22] : memref<1x32x256xf32, #tpu.memory_space<vmem>>, vector<1x32x256xf32>
    %30 = vector.shape_cast %29 : vector<1x32x256xf32> to vector<32x256xf32>
    %31 = vector.shape_cast %28 : vector<32x256xf32> to vector<1x32x256xf32>
    tpu.vector_store %arg7[%c0_20, %c0_21, %c0_22], %31 {strides = array<i32>} : memref<1x32x256xf32, #tpu.memory_space<vmem>>, vector<1x32x256xf32>,
    return
  }
  func.func @transform_0(%arg0: i32, %arg1: i32) -> (i32, i32, i32) {
    %c0_i32 = arith.constant 0 : i32
    %c0_i32_0 = arith.constant 0 : i32
    %c0_i32_1 = arith.constant 0 : i32
    return %arg0, %c0_i32, %c0_i32_0 : i32, i32, i32
  }
  func.func @transform_1(%arg0: i32, %arg1: i32) -> (i32, i32, i32) {
    %c0_i32 = arith.constant 0 : i32
    %c0_i32_0 = arith.constant 0 : i32
    %c0_i32_1 = arith.constant 0 : i32
    return %arg1, %c0_i32, %c0_i32_0 : i32, i32, i32
  }
  func.func @transform_2(%arg0: i32, %arg1: i32) -> (i32, i32, i32) {
    %c0_i32 = arith.constant 0 : i32
    %c0_i32_0 = arith.constant 0 : i32
    %c0_i32_1 = arith.constant 0 : i32
    %c0_i32_2 = arith.constant 0 : i32
    return %c0_i32, %c0_i32_0, %c0_i32_1 : i32, i32, i32
  }
  func.func @transform_3(%arg0: i32, %arg1: i32) -> (i32, i32) {
    %c0_i32 = arith.constant 0 : i32
    %c0_i32_0 = arith.constant 0 : i32
    %c0_i32_1 = arith.constant 0 : i32
    return %c0_i32, %c0_i32_0 : i32, i32
  }
  func.func @transform_4(%arg0: i32, %arg1: i32) -> (i32, i32) {
    %c0_i32 = arith.constant 0 : i32
    %c0_i32_0 = arith.constant 0 : i32
    %c0_i32_1 = arith.constant 0 : i32
    return %c0_i32, %c0_i32_0 : i32, i32
  }
  func.func @transform_5(%arg0: i32, %arg1: i32) -> (i32, i32, i32) {
    %c0_i32 = arith.constant 0 : i32
    %c0_i32_0 = arith.constant 0 : i32
    return %arg0, %arg1, %c0_i32 : i32, i32, i32
  }
}

</mosaic_0001>

<bundles_post_ra>
// kernel: tile.13
= control target key start
LH: loop header
LB: loop body
LE: loop exit
PB: predicated region body
PF: predicated region fallthrough
CT: control target
= control target key end

     0   :  { %s40_s0 = inlined_call_operand.vmem [shape: f32[8], index: 0, kind: input, shape index: {}]   ;;  %s41_s1 = inlined_call_operand.vmem [shape: f32[32,8], index: 1, kind: output, shape index: {}]  }
   0x1   :  { %v4_v0 = vld [vmem:[%s40_s0] ss:$0 sm:$0xff] }
   0x2   :  { %5 = vst [vmem:[%s41_s1] sm:$0xff] %v4_v0  ;;  %12 = vst [vmem:[%s41_s1 + $0x8] sm:$0xff] %v4_v0 }
   0x3   :  { %13 = vst [vmem:[%s41_s1 + $0x10] sm:$0xff] %v4_v0  ;;  %14 = vst [vmem:[%s41_s1 + $0x18] sm:$0xff] %v4_v0 }

// kernel: tile.14
= control target key start
LH: loop header
LB: loop body
LE: loop exit
PB: predicated region body
PF: predicated region fallthrough
CT: control target
= control target key end

     0   :  { %s7_s6 = smov 3  ;;  %s21_s9 = smov 3  ;;  %vm4_vm0 = vcmask 64512   ;;  %vm11_vm1 = vcmask 1048512   ;;  %vm18_vm2 = vcmask 982912   ;;  %vm25_vm3 = vcmask 917312   ;;  %s232_s0 = inlined_call_operand.vmem [shape: f32[32,8], index: 0, kind: input, shape index: {}]   ;;  %s233_s1 = inlined_call_operand.vmem [shape: f32[1,256], index: 1, kind: output, shape index: {}]  }
   0x1   :  { %v122_v0 = vld [vmem:[%s232_s0 + $0xf] ss:$16 sm:%s7_s6]   ;;  %s153_s10 = smov 120   ;;  %v124_v1 = vld [vmem:[%s232_s0 + $0xd] ss:$16 sm:%s21_s9]   ;;  %s14_s13 = smov 3 }
   0x2   :  { %9 = vrot.lane.b32.xlu0 %v122_v0, %s153_s10  ;;  %s154_s14 = smov 104   ;;  %v123_v2 = vld [vmem:[%s232_s0 + $0xe] ss:$16 sm:%s14_s13]   ;;  %s28_s17 = smov 3  ;;  %vm32_vm4 = vcmask 851712   ;;  %vm39_vm5 = vcmask 786112  }
   0x3   :  { %23 = vrot.lane.b32.xlu1 %v124_v1, %s154_s14  ;;  %v125_v3 = vld [vmem:[%s232_s0 + $0xc] ss:$16 sm:%s28_s17]   ;;  %s35_s20 = smov 3  ;;  %s42_s21 = smov 3  ;;  %vm46_vm6 = vcmask 720512   ;;  %vm53_vm7 = vcmask 654912  }
   0x4   :  { %s155_s22 = smov 112   ;;  %s156_s23 = smov 96   ;;  %v126_v4 = vld [vmem:[%s232_s0 + $0xb] ss:$16 sm:%s35_s20]   ;;  %v127_v5 = vld [vmem:[%s232_s0 + $0xa] ss:$16 sm:%s42_s21]  }
   0x5   :  { %s49_s28 = smov 3  ;;  %s56_s29 = smov 3  ;;  %vm60_vm8 = vcmask 589312   ;;  %vm67_vm9 = vcmask 523712   ;;  %vm74_vm10 = vcmask 458112   ;;  %vm81_vm11 = vcmask 392512  }
   0x6   :  { %16 = vrot.lane.b32.xlu0 %v123_v2, %s155_s22  ;;  %s157_s30 = smov 88   ;;  %s158_s2 = smov 80   ;;  %v128_v6 = vld [vmem:[%s232_s0 + $0x9] ss:$16 sm:%s49_s28]   ;;  %vm88_vm12 = vcmask 326912   ;;  %vm95_vm13 = vcmask 261312  }
   0x7   :  { %30 = vrot.lane.b32.xlu1 %v125_v3, %s156_s23  ;;  %v129_v7 = vld [vmem:[%s232_s0 + $0x8] ss:$16 sm:%s56_s29]   ;;  %s63_s7 = smov 3  ;;  %s70_s8 = smov 3  ;;  %vm102_vm14 = vcmask 195712   ;;  %vm109_vm15 = vcmask 130112  }
   0x8   :  { %s159_s9 = smov 72   ;;  %s160_s10 = smov 64   ;;  %v130_v8 = vld [vmem:[%s232_s0 + $0x7] ss:$16 sm:%s63_s7]   ;;  %v131_v9 = vld [vmem:[%s232_s0 + $0x6] ss:$16 sm:%s70_s8]  }
   0x9   :  { %s2_s13 = smov 3  ;;  %s77_s16 = smov 3 }
   0xa   :  { %37 = vrot.lane.b32.xlu0 %v126_v4, %s157_s30  ;;  %v3_v10 = vld [vmem:[%s232_s0] ss:$16 sm:%s2_s13]   ;;  %s84_s19 = smov 3  ;;  %s161_s20 = smov 56  }
   0xb   :  { %44 = vrot.lane.b32.xlu1 %v127_v5, %s158_s2  ;;  %5 = vst.msk [vmem:[#allocation0] ss:$8 sm:$0x3] %vm4_vm0, %v3_v10   ;;  %s162_s21 = smov 48   ;;  %v132_v11 = vld [vmem:[%s232_s0 + $0x5] ss:$16 sm:%s77_s16]  }
   0xc   :  { %v133_v12 = vld [vmem:[%s232_s0 + $0x4] ss:$16 sm:%s84_s19]   ;;  %s91_s26 = smov 3  ;;  %s98_s27 = smov 3 }
   0xd   :  { %s163_s28 = smov 40   ;;  %s164_s29 = smov 32   ;;  %v134_v13 = vld [vmem:[%s232_s0 + $0x3] ss:$16 sm:%s91_s26]   ;;  %v135_v14 = vld [vmem:[%s232_s0 + $0x2] ss:$16 sm:%s98_s27]  }
   0xe   :  { %51 = vrot.lane.b32.xlu0 %v128_v6, %s159_s9  ;;  %s105_s5 = smov 3  ;;  %s165_s6 = smov 24  }
   0xf   :  { %58 = vrot.lane.b32.xlu1 %v129_v7, %s160_s10  ;;  %s166_s7 = smov 16   ;;  %v136_v15 = vld [vmem:[%s232_s0 + $0x1] ss:$16 sm:%s105_s5]   ;;  %s167_s0 = smov 8  }
  0x12   :  { %65 = vrot.lane.b32.xlu0 %v130_v8, %s161_s20 }
  0x13   :  { %72 = vrot.lane.b32.xlu1 %v131_v9, %s162_s21 }
  0x16   :  { %79 = vrot.lane.b32.xlu0 %v132_v11, %s163_s28 }
  0x17   :  { %86 = vrot.lane.b32.xlu1 %v133_v12, %s164_s29 }
  0x1a   :  { %93 = vrot.lane.b32.xlu0 %v134_v13, %s165_s6 }
  0x1b   :  { %100 = vrot.lane.b32.xlu1 %v135_v14, %s166_s7 }
  0x1e   :  { %107 = vrot.lane.b32.xlu0 %v136_v15, %s167_s0 }
  0x74   :  { %v10_v16 = vpop.permute.xlu0 %9  }
  0x75   :  { %12 = vst.msk [vmem:[#allocation0] ss:$8 sm:$0x3] %vm11_vm1, %v10_v16   ;;  %v24_v17 = vpop.permute.xlu1 %23  }
  0x78   :  { %v17_v18 = vpop.permute.xlu0 %16  }
  0x79   :  { %19 = vst.msk [vmem:[#allocation0] ss:$8 sm:$0x3] %vm18_vm2, %v17_v18   ;;  %v31_v19 = vpop.permute.xlu1 %30  }
  0x7a   :  { %26 = vst.msk [vmem:[#allocation0] ss:$8 sm:$0x3] %vm25_vm3, %v24_v17  }
  0x7b   :  { %33 = vst.msk [vmem:[#allocation0] ss:$8 sm:$0x3] %vm32_vm4, %v31_v19  }
  0x7c   :  { %v38_v20 = vpop.permute.xlu0 %37  }
  0x7d   :  { %40 = vst.msk [vmem:[#allocation0] ss:$8 sm:$0x3] %vm39_vm5, %v38_v20   ;;  %v45_v21 = vpop.permute.xlu1 %44  }
  0x7e   :  { %47 = vst.msk [vmem:[#allocation0] ss:$8 sm:$0x3] %vm46_vm6, %v45_v21  }
  0x80   :  { %v52_v22 = vpop.permute.xlu0 %51  }
  0x81   :  { %54 = vst.msk [vmem:[#allocation0] ss:$8 sm:$0x3] %vm53_vm7, %v52_v22   ;;  %v59_v23 = vpop.permute.xlu1 %58  }
  0x82   :  { %61 = vst.msk [vmem:[#allocation0] ss:$8 sm:$0x3] %vm60_vm8, %v59_v23  }
  0x84   :  { %v66_v24 = vpop.permute.xlu0 %65  }
  0x85   :  { %68 = vst.msk [vmem:[#allocation0] ss:$8 sm:$0x3] %vm67_vm9, %v66_v24   ;;  %v73_v25 = vpop.permute.xlu1 %72  }
  0x86   :  { %75 = vst.msk [vmem:[#allocation0] ss:$8 sm:$0x3] %vm74_vm10, %v73_v25  }
  0x88   :  { %v80_v26 = vpop.permute.xlu0 %79  }
  0x89   :  { %82 = vst.msk [vmem:[#allocation0] ss:$8 sm:$0x3] %vm81_vm11, %v80_v26   ;;  %v87_v27 = vpop.permute.xlu1 %86  }
  0x8a   :  { %89 = vst.msk [vmem:[#allocation0] ss:$8 sm:$0x3] %vm88_vm12, %v87_v27  }
  0x8c   :  { %v94_v28 = vpop.permute.xlu0 %93  }
  0x8d   :  { %96 = vst.msk [vmem:[#allocation0] ss:$8 sm:$0x3] %vm95_vm13, %v94_v28   ;;  %v101_v29 = vpop.permute.xlu1 %100  }
  0x8e   :  { %103 = vst.msk [vmem:[#allocation0] ss:$8 sm:$0x3] %vm102_vm14, %v101_v29  }
  0x90   :  { %v108_v30 = vpop.permute.xlu0 %107  }
  0x91   :  { %110 = vst.msk [vmem:[#allocation0] ss:$8 sm:$0x3] %vm109_vm15, %v108_v30  }
  0x98   :  { %v114_v31 = vld [vmem:[#allocation0] sm:$0x1]  ;;  %v118_v32 = vld [vmem:[#allocation0 + $0x8] sm:$0x1] }
  0x99   :  { %116 = vst [vmem:[%s233_s1] sm:$0x1] %v114_v31  ;;  %137 = vst [vmem:[%s233_s1 + $0x1] sm:$0x1] %v118_v32 }

// kernel: upconv_forward.2
= control target key start
LH: loop header
LB: loop body
LE: loop exit
PB: predicated region body
PF: predicated region fallthrough
CT: control target
= control target key end

     0   :  { %s1155_s15 = smov 0   ;;  %s1157_s16 = smov 0   ;;  %s1295_s0 = inlined_call_operand.vmem [shape: f32[2,16,64], index: 0, kind: input, shape index: {}]   ;;  %s1296_s1 = inlined_call_operand.vmem [shape: bf16[1,34,16], index: 1, kind: input, shape index: {}]   ;;  %s1297_s2 = inlined_call_operand.vmem [shape: bf16[3,64,256], index: 2, kind: input, shape index: {}]   ;;  %s1298_s3 = inlined_call_operand.vmem [shape: f32[2,1,1,256], index: 3, kind: output, shape index: {0}]   ;;  %s1299_s4 = inlined_call_operand.vmem [shape: f32[2,1,1,256], index: 4, kind: output, shape index: {1}]  }
   0x1   :  { %s1159_s17 = smov 0  }
   0x2 LB: > { %s27_s18 = sadd.s32 1, %s1120_s16  ;;  %p941_p0 = scmp.ge.s32.totalorder %s1124_s17, 1  ;;  %s1124_s17 = sphi %s1159_s17, %s15_s17   ;;  %s1120_s16 = sphi %s1157_s16, %s1301_s16   ;;  %s1116_s15 = sphi %s1155_s15, %s1300_s15  }
   0x3   : > { %p29_p1 = scmp.ge.s32.totalorder %s27_s18, 2  ;;  %p191_p2 = scmp.lt.s32.totalorder %s1124_s17, 3 }
   0x5   : > { %s1303_s18 = smov (%p29_p1, %s27_s18), 0  ;;  %p192_p3 = pnand %p941_p0, %p191_p2 }
   0x6   : > { %p233_p4 = scmp.lt.s32.totalorder (!%p192_p3), %s1116_s15, 1  ;;  %v1126_v0 = vmov (!%p192_p3), 0.0   ;;  %vm1127_vm0 = vmmov (!%p192_p3), 0   ;;  %v1066_v1 = vld [vmem:[%s1297_s2 + $0x4] ss:$8 sps:$4 sm:$0xff] (!%p192_p3)   ;;  %vm281_vm1 = vcmask (!%p192_p3), 130048  }
   0x7   : > { %195 = sbr.rel (%p192_p3) target bundleno = 503 (0x1f7), region = 32  ;;  %1005 = vmatprep.subr.bf16.mxu0 (!%p192_p3), %v1126_v0  ;;  %1007 = vmatprep.mubr.msk.bf16.mxu0 (!%p192_p3), %vm1127_vm0, %v1126_v0  ;;  %v1068_v2 = vld [vmem:[%s1297_s2] ss:$8 sps:$4 sm:$0xff] (!%p192_p3)   ;;  %v1069_v3 = vld [vmem:[%s1297_s2 + $0x14] ss:$8 sps:$4 sm:$0xff] (!%p192_p3)   ;;  %v1128_v19 = vmov (!%p192_p3), 0  }
   0x8   : > { %532 = vmatprep.subr.bf16.mxu1 (!%p192_p3), %v1066_v1  ;;  %v1071_v4 = vld [vmem:[%s1297_s2 + $0x10] ss:$8 sps:$4 sm:$0xff] (!%p192_p3)   ;;  %v1063_v7 = vld [vmem:[%s1296_s1] sm:$0xff] (!%p192_p3)   ;;  %v1064_v13 = vld [vmem:[%s1296_s1 + $0x8] sm:$0xff] (!%p192_p3)   ;;  %564 = vmatprep.mubr.bf16.mxu1 (!%p192_p3), %v1128_v19  ;;  %vm428_vm2 = vcmask (!%p192_p3), 523264   ;;  %vm597_vm3 = vcmask (!%p192_p3), 1046528  }
   0x9   : > { %533 = vmatpush1.bf16.msra.mxu1 (!%p192_p3), %v1068_v2  ;;  %v1072_v9 = vld [vmem:[%s1297_s2 + $0x40] ss:$8 sps:$4 sm:$0xff] (!%p192_p3)   ;;  %v1074_v10 = vld [vmem:[%s1297_s2 + $0x44] ss:$8 sps:$4 sm:$0xff] (!%p192_p3)   ;;  %v1078_v15 = vld [vmem:[%s1297_s2 + $0x34] ss:$8 sps:$4 sm:$0xff] (!%p192_p3)  }
   0xa   : > { %534 = vmatprep.subr.bf16.mxu1 (!%p192_p3), %v1069_v3  ;;  %v1075_v11 = vld [vmem:[%s1297_s2 + $0x24] ss:$8 sps:$4 sm:$0xff] (!%p192_p3)   ;;  %v1077_v12 = vld [vmem:[%s1297_s2 + $0x20] ss:$8 sps:$4 sm:$0xff] (!%p192_p3)   ;;  %v1080_v16 = vld [vmem:[%s1297_s2 + $0x30] ss:$8 sps:$4 sm:$0xff] (!%p192_p3)  }
   0xb   : > { %v1065_v14 = vld [vmem:[%s1296_s1 + $0x10] ss:$0 sps:$4 sm:$0x11] (!%p192_p3)   ;;  %v1086_v17 = vld [vmem:[%s1297_s2 + $0x84] ss:$8 sps:$4 sm:$0xff] (!%p192_p3)  }
   0xc   : > { %v1083_v18 = vld [vmem:[%s1297_s2 + $0x54] ss:$8 sps:$4 sm:$0xff] (!%p192_p3)   ;;  %v1081_v20 = vld [vmem:[%s1297_s2 + $0x50] ss:$8 sps:$4 sm:$0xff] (!%p192_p3)   ;;  %v1089_v21 = vld [vmem:[%s1297_s2 + $0x64] ss:$8 sps:$4 sm:$0xff] (!%p192_p3)  }
   0xd   : > { %535 = vmatpush1.bf16.msra.mxu1 (!%p192_p3), %v1071_v4  ;;  %v1087_v22 = vld [vmem:[%s1297_s2 + $0x60] ss:$8 sps:$4 sm:$0xff] (!%p192_p3)   ;;  %v1098_v23 = vld [vmem:[%s1297_s2 + $0x74] ss:$8 sps:$4 sm:$0xff] (!%p192_p3)   ;;  %v1096_v24 = vld [vmem:[%s1297_s2 + $0x70] ss:$8 sps:$4 sm:$0xff] (!%p192_p3)  }
   0xe   : > { %s1305_s15 = smov (!%p233_p4, %s1116_s15), 1  ;;  %536 = vmatprep.subr.bf16.mxu1 %v1075_v11  ;;  %v1084_v28 = vld [vmem:[%s1297_s2 + $0x80] ss:$8 sps:$4 sm:$0xff]   ;;  %v1092_v31 = vld [vmem:[%s1297_s2 + $0x94] ss:$8 sps:$4 sm:$0xff]  }
   0xf   : > { %s1000_s21 = sshll.u32 %s1305_s15, 4  ;;  %v1090_v32 = vld [vmem:[%s1297_s2 + $0x90] ss:$8 sps:$4 sm:$0xff]   ;;  %v1095_v34 = vld [vmem:[%s1297_s2 + $0xa4] ss:$8 sps:$4 sm:$0xff]   ;;  %s944_s7 = sshll.u32 %s1305_s15, 1 }
  0x10   : > { %s237_s26 = scalar_lea.vmem %s1295_s0, %s1000_s21  ;;  %v1093_v38 = vld [vmem:[%s1297_s2 + $0xa0] ss:$8 sps:$4 sm:$0xff]   ;;  %v1101_v42 = vld [vmem:[%s1297_s2 + $0xb4] ss:$8 sps:$4 sm:$0xff]   ;;  %v1099_v47 = vld [vmem:[%s1297_s2 + $0xb0] ss:$8 sps:$4 sm:$0xff]   ;;  %s250_s10 = scalar_lea.vmem %s1298_s3, %s944_s7 }
  0x11   : > { %v260_v5 = vld [vmem:[%s237_s26] sm:$0xff]  ;;  %v261_v6 = vld [vmem:[%s237_s26 + $0x8] sm:$0xff]  ;;  %537 = vmatpush1.bf16.msra.mxu1 %v1077_v12  ;;  %vm367_vm4 = vsmask.f32 7424  ;;  %s258_s13 = scalar_lea.vmem %s1299_s4, %s944_s7 }
  0x12   : > { %v262_v8 = vpack.c.bf16 %v261_v6, %v260_v5  ;;  %538 = vmatprep.subr.bf16.mxu1 %v1078_v15 }
  0x14   : > { %1006 = vmatpush3.bf16.msra.mxu0 %v262_v8 }
  0x15   : > { %435 = vmatprep.subr.bf16.mxu0 %v1074_v10  ;;  %539 = vmatpush1.bf16.msra.mxu1 %v1080_v16 }
  0x16   : > { %649 = vmatprep.subr.bf16.mxu1 %v1086_v17 }
  0x17   : > { %1008 = vmatmul.mubr.msk.bf16.vlgmr.msra.gmra.mrb[0].mxu0 %vm281_vm1, %v1063_v7 }
  0x18   : > { %1011 = vmatprep.mubr.msk.bf16.mxu0 %vm1127_vm0, %v1126_v0  ;;  %436 = vmatpush1.bf16.msra.mxu0 %v1072_v9 }
  0x19   : > { %437 = vmatprep.subr.bf16.mxu0 %v1083_v18 }
  0x1c   : > { %438 = vmatpush1.bf16.msra.mxu0 %v1081_v20 }
  0x1d   : > { %439 = vmatprep.subr.bf16.mxu0 %v1089_v21 }
  0x1f   : > { %1012 = vmatmul.mubr.msk.bf16.gmra.mrb[4].mxu0 %vm281_vm1, %v1064_v13 }
  0x20   : > { %1015 = vmatprep.mubr.msk.bf16.mxu0 %vm1127_vm0, %v1126_v0  ;;  %440 = vmatpush1.bf16.msra.mxu0 %v1087_v22 }
  0x21   : > { %441 = vmatprep.subr.bf16.mxu0 %v1098_v23 }
  0x24   : > { %442 = vmatpush1.bf16.msra.mxu0 %v1096_v24 }
  0x27   : > { %1016 = vmatmul.mubr.msk.bf16.gmra.mrb[8].mxu0 %vm281_vm1, %v1065_v14 }
  0x28   : > { %467 = vmatprep.mubr.bf16.mxu0 %v1128_v19 }
  0xea   : > { %v325_v25 = vpop.f32.mrb[0].mxu0 }
  0xeb   : > { %v1009_v26 = vpop.f32.mrb[1].mxu0 }
  0xec   : > { %v328_v27 = vpop.f32.mrb[2].mxu0 }
  0xed   : > { %v347_v29 = vpack.c.bf16 %v328_v27, %v325_v25  ;;  %v1010_v30 = vpop.f32.mrb[3].mxu0 }
  0xef   : > { %978 = vmatmul.mubr.msk.bf16.vlgmr.msra.gmra.mrb[0].mxu1 %vm428_vm2, %v347_v29  ;;  %v371_v33 = vshll.u32 %v347_v29, 16  ;;  %v369_v43 = vshrl.u32 %v347_v29, 16  ;;  %v598_v44 = vrot.slane %v347_v29, 1 }
  0xf0   : > { %650 = vmatpush1.bf16.msra.mxu1 %v1084_v28  ;;  %574 = vmatprep.mubr.bf16.mxu1 %v1128_v19 }
  0xf1   : > { %651 = vmatprep.subr.bf16.mxu1 %v1092_v31  ;;  %v373_v39 = vrot.slane %v371_v33, 1 }
  0xf2   : > { %v333_v35 = vpop.f32.mrb[4].mxu0 }
  0xf3   : > { %v1013_v36 = vpop.f32.mrb[5].mxu0  ;;  %v374_v48 = vor.u32 %v373_v39, %v369_v43 }
  0xf4   : > { %652 = vmatpush1.bf16.msra.mxu1 %v1090_v32  ;;  %v336_v37 = vpop.f32.mrb[6].mxu0 }
  0xf5   : > { %v348_v40 = vpack.c.bf16 %v336_v37, %v333_v35  ;;  %v1014_v41 = vpop.f32.mrb[7].mxu0  ;;  %653 = vmatprep.subr.bf16.mxu1 %v1095_v34 }
  0xf7   : > { %v376_v45 = vshll.u32 %v348_v40, 16  ;;  %v599_v46 = vrot.slane %v348_v40, 1  ;;  %979 = vmatmul.mubr.msk.bf16.gmra.mrb[4].mxu1 %vm428_vm2, %v348_v40  ;;  %v380_v56 = vshrl.u32 %v348_v40, 16 }
  0xf8   : > { %654 = vmatpush1.bf16.msra.mxu1 %v1093_v38  ;;  %681 = vmatprep.mubr.bf16.mxu1 %v1128_v19 }
  0xf9   : > { %v378_v49 = vrot.slane %v376_v45, 1  ;;  %655 = vmatprep.subr.bf16.mxu1 %v1101_v42  ;;  %v600_v50 = vsel %vm597_vm3, %v598_v44, %v599_v46 }
  0xfa   : > { %v341_v51 = vpop.f32.mrb[8].mxu0 }
  0xfb   : > { %v349_v52 = vpack.c.bf16 %v341_v51, %v341_v51  ;;  %v379_v53 = vsel %vm367_vm4, %v374_v48, %v378_v49  ;;  %v1017_v54 = vpop.f32.mrb[9].mxu0  ;;  %v382_v61 = vor.u32 %v380_v56, %v378_v49  ;;  %v1129_v49 = vmov 1966171168  }
  0xfc   : > { %656 = vmatpush1.bf16.msra.mxu1 %v1099_v47  ;;  %968 = vmatmul.mubr.msk.bf16.vlgmr.msra.gmra.mrb[12].mxu0 %vm428_vm2, %v379_v53  ;;  %v344_v55 = vpop.f32.mrb[10].mxu0  ;;  %v734_v51 = vlaneseq }
  0xfd   : > { %v384_v57 = vshll.u32 %v349_v52, 16  ;;  %v601_v58 = vrot.slane %v349_v52, 1  ;;  %v1018_v59 = vpop.f32.mrb[11].mxu0  ;;  %477 = vmatprep.mubr.bf16.mxu0 %v1128_v19 }
  0xfe   : > { %vm748_vm5 = vcmp.lt.s32.totalorder %v734_v51, 256 }
  0xff   : > { %v386_v60 = vrot.slane %v384_v57, 1  ;;  %996 = vmatmul.mubr.msk.bf16.vlgmr.msra.gmra.mrb[0].mxu1 %vm428_vm2, %v600_v50  ;;  %v602_v62 = vsel %vm597_vm3, %v599_v46, %v601_v58  ;;  %v732_v50 = vunpack.c.l.s4 %v1129_v49 }
 0x100   : > { %691 = vmatprep.mubr.bf16.mxu1 %v1128_v19 }
 0x101   : > { %v387_v63 = vsel %vm367_vm4, %v382_v61, %v386_v60  ;;  %v733_v60 = vunpack.c.0.s8 %v732_v50  ;;  %v735_v61 = vshrl.u32 %v734_v51, 7 }
 0x104   : > { %969 = vmatmul.mubr.msk.bf16.gmra.mrb[16].mxu0 %vm428_vm2, %v387_v63 }
 0x107   : > { %997 = vmatmul.mubr.msk.bf16.gmra.mrb[4].mxu1 %vm428_vm2, %v602_v62 }
 0x1cf   : > { %v469_v0 = vpop.f32.mrb[12].mxu0 }
 0x1d0   : > { %v471_v1 = vpop.f32.mrb[13].mxu0 }
 0x1d1   : > { %v473_v2 = vpop.f32.mrb[14].mxu0 }
 0x1d2   : > { %v475_v3 = vpop.f32.mrb[15].mxu0  ;;  %v683_v4 = vpop.f32.mrb[0].mxu1 }
 0x1d3   : > { %v1019_v5 = vadd.f32 %v683_v4, %v469_v0  ;;  %v685_v6 = vpop.f32.mrb[1].mxu1 }
 0x1d4   : > { %v1020_v7 = vadd.f32 %v685_v6, %v471_v1  ;;  %v687_v8 = vpop.f32.mrb[2].mxu1  ;;  %v736_v6 = vsub.s32 %v733_v60, %v735_v61 }
 0x1d5   : > { %v1021_v9 = vadd.f32 %v687_v8, %v473_v2  ;;  %v689_v10 = vpop.f32.mrb[3].mxu1  ;;  %v751_v12 = vmul.f32 %v1019_v5, %v1019_v5 }
 0x1d6   : > { %v1022_v11 = vadd.f32 %v689_v10, %v475_v3  ;;  %v752_v16 = vmul.f32 %v1020_v7, %v1020_v7 }
 0x1d7   : > { %v710_v13 = vadd.f32 %v1021_v9, %v1019_v5  ;;  %v753_v14 = vmul.f32 %v1021_v9, %v1021_v9  ;;  %v479_v15 = vpop.f32.mrb[16].mxu0 }
 0x1d8   : > { %v719_v17 = vadd.f32 %v1022_v11, %v1020_v7  ;;  %v754_v18 = vmul.f32 %v1022_v11, %v1022_v11  ;;  %v481_v19 = vpop.f32.mrb[17].mxu0 }
 0x1d9   : > { %v759_v20 = vadd.f32 %v753_v14, %v751_v12  ;;  %v483_v21 = vpop.f32.mrb[18].mxu0 }
 0x1da   : > { %v768_v22 = vadd.f32 %v754_v18, %v752_v16  ;;  %v485_v23 = vpop.f32.mrb[19].mxu0  ;;  %v693_v24 = vpop.f32.mrb[4].mxu1 }
 0x1db   : > { %v1023_v25 = vadd.f32 %v693_v24, %v479_v15  ;;  %v695_v26 = vpop.f32.mrb[5].mxu1 }
 0x1dc   : > { %v1024_v27 = vadd.f32 %v695_v26, %v481_v19  ;;  %v697_v28 = vpop.f32.mrb[6].mxu1 }
 0x1dd   : > { %v711_v29 = vadd.f32 %v1023_v25, %v710_v13  ;;  %v755_v30 = vmul.f32 %v1023_v25, %v1023_v25  ;;  %v1025_v31 = vadd.f32 %v697_v28, %v483_v21  ;;  %v699_v32 = vpop.f32.mrb[7].mxu1 }
 0x1de   : > { %v720_v33 = vadd.f32 %v1024_v27, %v719_v17  ;;  %v756_v34 = vmul.f32 %v1024_v27, %v1024_v27  ;;  %v1026_v35 = vadd.f32 %v699_v32, %v485_v23 }
 0x1df   : > { %v760_v36 = vadd.f32 %v759_v20, %v755_v30  ;;  %v712_v37 = vadd.f32 %v1025_v31, %v711_v29  ;;  %v757_v38 = vmul.f32 %v1025_v31, %v1025_v31 }
 0x1e0   : > { %v769_v39 = vadd.f32 %v768_v22, %v756_v34  ;;  %v721_v40 = vadd.f32 %v1026_v35, %v720_v33  ;;  %v758_v41 = vmul.f32 %v1026_v35, %v1026_v35 }
 0x1e1   : > { %v713_v42 = vrot.slane %v712_v37, 4  ;;  %v761_v43 = vadd.f32 %v760_v36, %v757_v38 }
 0x1e2   : > { %v722_v44 = vrot.slane %v721_v40, 4  ;;  %v770_v45 = vadd.f32 %v769_v39, %v758_v41 }
 0x1e3   : > { %v714_v46 = vadd.f32 %v713_v42, %v712_v37  ;;  %v762_v47 = vrot.slane %v761_v43, 4 }
 0x1e4   : > { %v723_v48 = vadd.f32 %v722_v44, %v721_v40  ;;  %v771_v52 = vrot.slane %v770_v45, 4 }
 0x1e5   : > { %v715_v53 = vrot.slane %v714_v46, 2  ;;  %v763_v54 = vadd.f32 %v762_v47, %v761_v43 }
 0x1e6   : > { %v724_v55 = vrot.slane %v723_v48, 2  ;;  %v772_v56 = vadd.f32 %v771_v52, %v770_v45 }
 0x1e7   : > { %v716_v57 = vadd.f32 %v715_v53, %v714_v46  ;;  %v764_v58 = vrot.slane %v763_v54, 2 }
 0x1e8   : > { %v725_v59 = vadd.f32 %v724_v55, %v723_v48  ;;  %v773_v62 = vrot.slane %v772_v56, 2 }
 0x1e9   : > { %v717_v63 = vrot.slane %v716_v57, 1  ;;  %v765_v0 = vadd.f32 %v764_v58, %v763_v54 }
 0x1ea   : > { %v726_v1 = vrot.slane %v725_v59, 1  ;;  %v774_v2 = vadd.f32 %v773_v62, %v772_v56 }
 0x1eb   : > { %v718_v3 = vadd.f32 %v717_v63, %v716_v57  ;;  %v766_v4 = vrot.slane %v765_v0, 1 }
 0x1ec   : > { %v727_v5 = vadd.f32 %v726_v1, %v725_v59  ;;  %v775_v7 = vrot.slane %v774_v2, 1 }
 0x1ed   : > { %v767_v8 = vadd.f32 %v766_v4, %v765_v0 }
 0x1ee   : > { %v730_v9 = vcombine.low %v718_v3, %v727_v5  ;;  %v776_v10 = vadd.f32 %v775_v7, %v774_v2 }
 0x1f0   : > { %v737_v11 = vrot.slane %v730_v9, %v736_v6  ;;  %v779_v12 = vcombine.low %v767_v8, %v776_v10 }
 0x1f2   : > { %v744_v13 = vrot.slane %v737_v11, %v736_v6  ;;  %v786_v14 = vrot.slane %v779_v12, %v736_v6 }
 0x1f4   : > { %750 = vst.msk [vmem:[%s250_s10] sm:$0x3] %vm748_vm5, %v744_v13  ;;  %v793_v15 = vrot.slane %v786_v14, %v736_v6 }
 0x1f6   : > { %795 = vst.msk [vmem:[%s258_s13] sm:$0x3] %vm748_vm5, %v793_v15 }
 0x1f7 PF: > { %s15_s17 = sadd.s32 1, %s1124_s17   ;;  %s1300_s15 = smov %s1120_s16 }
 0x1f8   : > { %p12_p5 = scmp.ge.s32.totalorder %s15_s17, 4   ;;  %s1301_s16 = smov %s1303_s18 }
 0x1fa   :  { %14 = sbr.rel (!%p12_p5) target bundleno = 2 (0x2), region = 79 }

// kernel: upconv_forward.3
= control target key start
LH: loop header
LB: loop body
LE: loop exit
PB: predicated region body
PF: predicated region fallthrough
CT: control target
= control target key end

     0   :  { %s1102_s18 = smov 0   ;;  %s1104_s19 = smov 0   ;;  %s1255_s0 = inlined_call_operand.vmem [shape: f32[2,16,64], index: 0, kind: input, shape index: {}]   ;;  %s1256_s1 = inlined_call_operand.vmem [shape: bf16[1,34,16], index: 1, kind: input, shape index: {}]   ;;  %s1257_s2 = inlined_call_operand.vmem [shape: bf16[3,64,256], index: 2, kind: input, shape index: {}]   ;;  %s1258_s3 = inlined_call_operand.vmem [shape: f32[1,256], index: 3, kind: input, shape index: {}]   ;;  %s1259_s4 = inlined_call_operand.vmem [shape: f32[1,256], index: 4, kind: input, shape index: {}]   ;;  %s1260_s5 = inlined_call_operand.vmem [shape: f32[2,32,256], index: 5, kind: output, shape index: {}]  }
   0x1   :  { %s1106_s20 = smov 0  }
   0x2 LB: > { %s27_s21 = sadd.s32 1, %s1063_s19  ;;  %p884_p0 = scmp.ge.s32.totalorder %s1067_s20, 1  ;;  %s1067_s20 = sphi %s1106_s20, %s15_s20   ;;  %s1063_s19 = sphi %s1104_s19, %s1262_s19   ;;  %s1059_s18 = sphi %s1102_s18, %s1261_s18  }
   0x3   : > { %p29_p1 = scmp.ge.s32.totalorder %s27_s21, 2  ;;  %p211_p2 = scmp.lt.s32.totalorder %s1067_s20, 3 }
   0x5   : > { %s1264_s21 = smov (%p29_p1, %s27_s21), 0  ;;  %p212_p3 = pnand %p884_p0, %p211_p2 }
   0x6   : > { %p249_p4 = scmp.lt.s32.totalorder (!%p212_p3), %s1059_s18, 1  ;;  %v1069_v0 = vmov (!%p212_p3), 0.0   ;;  %vm1070_vm0 = vmmov (!%p212_p3), 0   ;;  %v1009_v1 = vld [vmem:[%s1257_s2 + $0x4] ss:$8 sps:$4 sm:$0xff] (!%p212_p3)   ;;  %vm292_vm1 = vcmask (!%p212_p3), 130048  }
   0x7   : > { %215 = sbr.rel (%p212_p3) target bundleno = 487 (0x1e7), region = 40  ;;  %949 = vmatprep.subr.bf16.mxu0 (!%p212_p3), %v1069_v0  ;;  %951 = vmatprep.mubr.msk.bf16.mxu0 (!%p212_p3), %vm1070_vm0, %v1069_v0  ;;  %v1011_v2 = vld [vmem:[%s1257_s2] ss:$8 sps:$4 sm:$0xff] (!%p212_p3)   ;;  %v1012_v3 = vld [vmem:[%s1257_s2 + $0x14] ss:$8 sps:$4 sm:$0xff] (!%p212_p3)   ;;  %v1071_v19 = vmov (!%p212_p3), 0  }
   0x8   : > { %543 = vmatprep.subr.bf16.mxu1 (!%p212_p3), %v1009_v1  ;;  %v1014_v4 = vld [vmem:[%s1257_s2 + $0x10] ss:$8 sps:$4 sm:$0xff] (!%p212_p3)   ;;  %v1006_v7 = vld [vmem:[%s1256_s1] sm:$0xff] (!%p212_p3)   ;;  %v1007_v13 = vld [vmem:[%s1256_s1 + $0x8] sm:$0xff] (!%p212_p3)   ;;  %575 = vmatprep.mubr.bf16.mxu1 (!%p212_p3), %v1071_v19  ;;  %vm439_vm2 = vcmask (!%p212_p3), 523264   ;;  %vm608_vm3 = vcmask (!%p212_p3), 1046528  }
   0x9   : > { %544 = vmatpush1.bf16.msra.mxu1 (!%p212_p3), %v1011_v2  ;;  %v1015_v9 = vld [vmem:[%s1257_s2 + $0x40] ss:$8 sps:$4 sm:$0xff] (!%p212_p3)   ;;  %v1017_v10 = vld [vmem:[%s1257_s2 + $0x44] ss:$8 sps:$4 sm:$0xff] (!%p212_p3)   ;;  %v1021_v15 = vld [vmem:[%s1257_s2 + $0x34] ss:$8 sps:$4 sm:$0xff] (!%p212_p3)  }
   0xa   : > { %545 = vmatprep.subr.bf16.mxu1 (!%p212_p3), %v1012_v3  ;;  %v1018_v11 = vld [vmem:[%s1257_s2 + $0x24] ss:$8 sps:$4 sm:$0xff] (!%p212_p3)   ;;  %v1020_v12 = vld [vmem:[%s1257_s2 + $0x20] ss:$8 sps:$4 sm:$0xff] (!%p212_p3)   ;;  %v1023_v16 = vld [vmem:[%s1257_s2 + $0x30] ss:$8 sps:$4 sm:$0xff] (!%p212_p3)  }
   0xb   : > { %v1008_v14 = vld [vmem:[%s1256_s1 + $0x10] ss:$0 sps:$4 sm:$0x11] (!%p212_p3)   ;;  %v1029_v17 = vld [vmem:[%s1257_s2 + $0x84] ss:$8 sps:$4 sm:$0xff] (!%p212_p3)  }
   0xc   : > { %v1026_v18 = vld [vmem:[%s1257_s2 + $0x54] ss:$8 sps:$4 sm:$0xff] (!%p212_p3)   ;;  %v1024_v20 = vld [vmem:[%s1257_s2 + $0x50] ss:$8 sps:$4 sm:$0xff] (!%p212_p3)   ;;  %v1032_v21 = vld [vmem:[%s1257_s2 + $0x64] ss:$8 sps:$4 sm:$0xff] (!%p212_p3)  }
   0xd   : > { %546 = vmatpush1.bf16.msra.mxu1 (!%p212_p3), %v1014_v4  ;;  %v1030_v22 = vld [vmem:[%s1257_s2 + $0x60] ss:$8 sps:$4 sm:$0xff] (!%p212_p3)   ;;  %v1041_v23 = vld [vmem:[%s1257_s2 + $0x74] ss:$8 sps:$4 sm:$0xff] (!%p212_p3)   ;;  %v1039_v24 = vld [vmem:[%s1257_s2 + $0x70] ss:$8 sps:$4 sm:$0xff] (!%p212_p3)  }
   0xe   : > { %s1266_s18 = smov (!%p249_p4, %s1059_s18), 1  ;;  %547 = vmatprep.subr.bf16.mxu1 %v1018_v11  ;;  %v1027_v28 = vld [vmem:[%s1257_s2 + $0x80] ss:$8 sps:$4 sm:$0xff]   ;;  %v1035_v31 = vld [vmem:[%s1257_s2 + $0x94] ss:$8 sps:$4 sm:$0xff]  }
   0xf   : > { %s943_s24 = sshll.u32 %s1266_s18, 4  ;;  %v1033_v32 = vld [vmem:[%s1257_s2 + $0x90] ss:$8 sps:$4 sm:$0xff]   ;;  %v1038_v34 = vld [vmem:[%s1257_s2 + $0xa4] ss:$8 sps:$4 sm:$0xff]   ;;  %s944_s17 = sshll.u32 %s1266_s18, 6 }
  0x10   : > { %s253_s29 = scalar_lea.vmem %s1255_s0, %s943_s24  ;;  %v1036_v38 = vld [vmem:[%s1257_s2 + $0xa0] ss:$8 sps:$4 sm:$0xff]   ;;  %v1044_v42 = vld [vmem:[%s1257_s2 + $0xb4] ss:$8 sps:$4 sm:$0xff]   ;;  %v1042_v47 = vld [vmem:[%s1257_s2 + $0xb0] ss:$8 sps:$4 sm:$0xff]   ;;  %s1236_s24 = scalar_lea.vmem %s1260_s5, %s944_s17 }
  0x11   : > { %v271_v5 = vld [vmem:[%s253_s29] sm:$0xff]  ;;  %v272_v6 = vld [vmem:[%s253_s29 + $0x8] sm:$0xff]  ;;  %548 = vmatpush1.bf16.msra.mxu1 %v1020_v12  ;;  %vm378_vm4 = vsmask.f32 7424 }
  0x12   : > { %v273_v8 = vpack.c.bf16 %v272_v6, %v271_v5  ;;  %549 = vmatprep.subr.bf16.mxu1 %v1021_v15  ;;  %v721_v3 = vld [vmem:[%s1258_s3] sm:$0x3] }
  0x14   : > { %950 = vmatpush3.bf16.msra.mxu0 %v273_v8 }
  0x15   : > { %446 = vmatprep.subr.bf16.mxu0 %v1017_v10  ;;  %550 = vmatpush1.bf16.msra.mxu1 %v1023_v16 }
  0x16   : > { %660 = vmatprep.subr.bf16.mxu1 %v1029_v17 }
  0x17   : > { %952 = vmatmul.mubr.msk.bf16.vlgmr.msra.gmra.mrb[0].mxu0 %vm292_vm1, %v1006_v7  ;;  %v741_v7 = vld [vmem:[%s1259_s4] sm:$0x3] }
  0x18   : > { %955 = vmatprep.mubr.msk.bf16.mxu0 %vm1070_vm0, %v1069_v0  ;;  %447 = vmatpush1.bf16.msra.mxu0 %v1015_v9 }
  0x19   : > { %448 = vmatprep.subr.bf16.mxu0 %v1026_v18 }
  0x1c   : > { %449 = vmatpush1.bf16.msra.mxu0 %v1024_v20 }
  0x1d   : > { %450 = vmatprep.subr.bf16.mxu0 %v1032_v21 }
  0x1f   : > { %956 = vmatmul.mubr.msk.bf16.gmra.mrb[4].mxu0 %vm292_vm1, %v1007_v13 }
  0x20   : > { %959 = vmatprep.mubr.msk.bf16.mxu0 %vm1070_vm0, %v1069_v0  ;;  %451 = vmatpush1.bf16.msra.mxu0 %v1030_v22  ;;  %v723_v0 = vlaneseq }
  0x21   : > { %452 = vmatprep.subr.bf16.mxu0 %v1041_v23 }
  0x22   : > { %v724_v1 = vshrl.u32 %v723_v0, 7 }
  0x24   : > { %453 = vmatpush1.bf16.msra.mxu0 %v1039_v24  ;;  %v725_v2 = vsub.s32 0, %v724_v1  ;;  %v729_v4 = vsub.s32 1, %v724_v1 }
  0x26   : > { %v726_v9 = vrot.slane %v721_v3, %v725_v2  ;;  %v730_v12 = vrot.slane %v721_v3, %v729_v4  ;;  %v750_v17 = vrot.slane %v741_v7, %v729_v4 }
  0x27   : > { %960 = vmatmul.mubr.msk.bf16.gmra.mrb[8].mxu0 %vm292_vm1, %v1008_v14  ;;  %v746_v14 = vrot.slane %v741_v7, %v725_v2 }
  0x28   : > { %478 = vmatprep.mubr.bf16.mxu0 %v1071_v19 }
  0xea   : > { %v336_v25 = vpop.f32.mrb[0].mxu0 }
  0xeb   : > { %v953_v26 = vpop.f32.mrb[1].mxu0 }
  0xec   : > { %v339_v27 = vpop.f32.mrb[2].mxu0 }
  0xed   : > { %v358_v29 = vpack.c.bf16 %v339_v27, %v336_v25  ;;  %v954_v30 = vpop.f32.mrb[3].mxu0 }
  0xef   : > { %921 = vmatmul.mubr.msk.bf16.vlgmr.msra.gmra.mrb[0].mxu1 %vm439_vm2, %v358_v29  ;;  %v382_v33 = vshll.u32 %v358_v29, 16  ;;  %v380_v43 = vshrl.u32 %v358_v29, 16  ;;  %v609_v44 = vrot.slane %v358_v29, 1 }
  0xf0   : > { %661 = vmatpush1.bf16.msra.mxu1 %v1027_v28  ;;  %585 = vmatprep.mubr.bf16.mxu1 %v1071_v19 }
  0xf1   : > { %662 = vmatprep.subr.bf16.mxu1 %v1035_v31  ;;  %v384_v39 = vrot.slane %v382_v33, 1 }
  0xf2   : > { %v344_v35 = vpop.f32.mrb[4].mxu0 }
  0xf3   : > { %v957_v36 = vpop.f32.mrb[5].mxu0  ;;  %v385_v48 = vor.u32 %v384_v39, %v380_v43 }
  0xf4   : > { %663 = vmatpush1.bf16.msra.mxu1 %v1033_v32  ;;  %v347_v37 = vpop.f32.mrb[6].mxu0 }
  0xf5   : > { %v359_v40 = vpack.c.bf16 %v347_v37, %v344_v35  ;;  %v958_v41 = vpop.f32.mrb[7].mxu0  ;;  %664 = vmatprep.subr.bf16.mxu1 %v1038_v34 }
  0xf7   : > { %v387_v45 = vshll.u32 %v359_v40, 16  ;;  %v610_v46 = vrot.slane %v359_v40, 1  ;;  %922 = vmatmul.mubr.msk.bf16.gmra.mrb[4].mxu1 %vm439_vm2, %v359_v40  ;;  %v391_v56 = vshrl.u32 %v359_v40, 16 }
  0xf8   : > { %665 = vmatpush1.bf16.msra.mxu1 %v1036_v38  ;;  %692 = vmatprep.mubr.bf16.mxu1 %v1071_v19 }
  0xf9   : > { %v389_v49 = vrot.slane %v387_v45, 1  ;;  %666 = vmatprep.subr.bf16.mxu1 %v1044_v42  ;;  %v611_v50 = vsel %vm608_vm3, %v609_v44, %v610_v46 }
  0xfa   : > { %v352_v51 = vpop.f32.mrb[8].mxu0 }
  0xfb   : > { %v360_v52 = vpack.c.bf16 %v352_v51, %v352_v51  ;;  %v390_v53 = vsel %vm378_vm4, %v385_v48, %v389_v49  ;;  %v961_v54 = vpop.f32.mrb[9].mxu0  ;;  %v393_v61 = vor.u32 %v391_v56, %v389_v49 }
  0xfc   : > { %667 = vmatpush1.bf16.msra.mxu1 %v1042_v47  ;;  %911 = vmatmul.mubr.msk.bf16.vlgmr.msra.gmra.mrb[12].mxu0 %vm439_vm2, %v390_v53  ;;  %v355_v55 = vpop.f32.mrb[10].mxu0 }
  0xfd   : > { %v395_v57 = vshll.u32 %v360_v52, 16  ;;  %v612_v58 = vrot.slane %v360_v52, 1  ;;  %v962_v59 = vpop.f32.mrb[11].mxu0  ;;  %488 = vmatprep.mubr.bf16.mxu0 %v1071_v19 }
  0xff   : > { %v397_v60 = vrot.slane %v395_v57, 1  ;;  %939 = vmatmul.mubr.msk.bf16.vlgmr.msra.gmra.mrb[0].mxu1 %vm439_vm2, %v611_v50  ;;  %v613_v62 = vsel %vm608_vm3, %v610_v46, %v612_v58 }
 0x100   : > { %702 = vmatprep.mubr.bf16.mxu1 %v1071_v19 }
 0x101   : > { %v398_v63 = vsel %vm378_vm4, %v393_v61, %v397_v60 }
 0x104   : > { %912 = vmatmul.mubr.msk.bf16.gmra.mrb[16].mxu0 %vm439_vm2, %v398_v63 }
 0x107   : > { %940 = vmatmul.mubr.msk.bf16.gmra.mrb[4].mxu1 %vm439_vm2, %v613_v62 }
 0x1cf   : > { %v480_v5 = vpop.f32.mrb[12].mxu0 }
 0x1d0   : > { %v482_v6 = vpop.f32.mrb[13].mxu0 }
 0x1d1   : > { %v484_v8 = vpop.f32.mrb[14].mxu0 }
 0x1d2   : > { %v486_v10 = vpop.f32.mrb[15].mxu0  ;;  %v694_v11 = vpop.f32.mrb[0].mxu1 }
 0x1d3   : > { %v963_v13 = vadd.f32 %v694_v11, %v480_v5  ;;  %v696_v15 = vpop.f32.mrb[1].mxu1 }
 0x1d4   : > { %v964_v16 = vadd.f32 %v696_v15, %v482_v6  ;;  %v698_v18 = vpop.f32.mrb[2].mxu1 }
 0x1d5   : > { %v733_v19 = vmul.f32 %v963_v13, %v726_v9  ;;  %v965_v20 = vadd.f32 %v698_v18, %v484_v8  ;;  %v700_v21 = vpop.f32.mrb[3].mxu1 }
 0x1d6   : > { %v734_v22 = vmul.f32 %v964_v16, %v730_v12  ;;  %v966_v23 = vadd.f32 %v700_v21, %v486_v10 }
 0x1d7   : > { %v753_v24 = vadd.f32 %v746_v14, %v733_v19  ;;  %v735_v25 = vmul.f32 %v965_v20, %v726_v9  ;;  %v490_v26 = vpop.f32.mrb[16].mxu0 }
 0x1d8   : > { %v754_v27 = vadd.f32 %v750_v17, %v734_v22  ;;  %v736_v28 = vmul.f32 %v966_v23, %v730_v12  ;;  %v492_v29 = vpop.f32.mrb[17].mxu0 }
 0x1d9   : > { %v761_v30 = vmax.f32 %v753_v24, 0.0  ;;  %v755_v31 = vadd.f32 %v746_v14, %v735_v25  ;;  %v494_v32 = vpop.f32.mrb[18].mxu0 }
 0x1da   : > { %v762_v33 = vmax.f32 %v754_v27, 0.0  ;;  %v756_v34 = vadd.f32 %v750_v17, %v736_v28  ;;  %v496_v35 = vpop.f32.mrb[19].mxu0  ;;  %v704_v36 = vpop.f32.mrb[4].mxu1 }
 0x1db   : > { %769 = vst [vmem:[%s1236_s24] sm:$0xff] %v761_v30  ;;  %v763_v37 = vmax.f32 %v755_v31, 0.0  ;;  %v967_v38 = vadd.f32 %v704_v36, %v490_v26  ;;  %v706_v39 = vpop.f32.mrb[5].mxu1 }
 0x1dc   : > { %770 = vst [vmem:[%s1236_s24 + $0x8] sm:$0xff] %v762_v33  ;;  %v764_v40 = vmax.f32 %v756_v34, 0.0  ;;  %v968_v41 = vadd.f32 %v706_v39, %v492_v29  ;;  %v708_v42 = vpop.f32.mrb[6].mxu1 }
 0x1dd   : > { %771 = vst [vmem:[%s1236_s24 + $0x10] sm:$0xff] %v763_v37  ;;  %v737_v43 = vmul.f32 %v967_v38, %v726_v9  ;;  %v969_v44 = vadd.f32 %v708_v42, %v494_v32  ;;  %v710_v45 = vpop.f32.mrb[7].mxu1 }
 0x1de   : > { %772 = vst [vmem:[%s1236_s24 + $0x18] sm:$0xff] %v764_v40  ;;  %v738_v46 = vmul.f32 %v968_v41, %v730_v12  ;;  %v970_v47 = vadd.f32 %v710_v45, %v496_v35 }
 0x1df   : > { %v757_v48 = vadd.f32 %v746_v14, %v737_v43  ;;  %v739_v49 = vmul.f32 %v969_v44, %v726_v9 }
 0x1e0   : > { %v758_v50 = vadd.f32 %v750_v17, %v738_v46  ;;  %v740_v51 = vmul.f32 %v970_v47, %v730_v12 }
 0x1e1   : > { %v765_v52 = vmax.f32 %v757_v48, 0.0  ;;  %v759_v53 = vadd.f32 %v746_v14, %v739_v49 }
 0x1e2   : > { %v766_v54 = vmax.f32 %v758_v50, 0.0  ;;  %v760_v55 = vadd.f32 %v750_v17, %v740_v51 }
 0x1e3   : > { %773 = vst [vmem:[%s1236_s24 + $0x20] sm:$0xff] %v765_v52  ;;  %v767_v56 = vmax.f32 %v759_v53, 0.0 }
 0x1e4   : > { %774 = vst [vmem:[%s1236_s24 + $0x28] sm:$0xff] %v766_v54  ;;  %v768_v57 = vmax.f32 %v760_v55, 0.0 }
 0x1e5   : > { %775 = vst [vmem:[%s1236_s24 + $0x30] sm:$0xff] %v767_v56 }
 0x1e6   : > { %776 = vst [vmem:[%s1236_s24 + $0x38] sm:$0xff] %v768_v57 }
 0x1e7 PF: > { %s15_s20 = sadd.s32 1, %s1067_s20   ;;  %s1261_s18 = smov %s1063_s19 }
 0x1e8   : > { %p12_p5 = scmp.ge.s32.totalorder %s15_s20, 4   ;;  %s1262_s19 = smov %s1264_s21 }
 0x1ea   :  { %14 = sbr.rel (!%p12_p5) target bundleno = 2 (0x2), region = 75 }

</bundles_post_ra>
